<compile_context>
chip_gen: v6e
topology: v6e:2x2x1
jax: 0.10.0
libtpu: 0.0.40
codegen_flags: <defaults>
</compile_context>

<pallas_src>
import math
from functools import partial

import jax
import jax.numpy as jnp
from jax.experimental import pallas as pl
from jax.experimental.pallas import tpu as pltpu

BN_EPS = 1e-5
LAYER_CFG = [(64, 3, 1), (128, 4, 2), (256, 6, 2), (512, 3, 2)]  # ResNet-50
VMEM_LIMIT = 32 * 1024 * 1024


def _round_up(x, m):
    return (x + m - 1) // m * m


_MULTI_TC = None


def _multi_tc():
    """True on chips with 2 TensorCores per chip (v4 / v5p / v7x)."""
    global _MULTI_TC
    if _MULTI_TC is None:
        try:
            kind = jax.devices()[0].device_kind.lower()
            _MULTI_TC = any(t in kind for t in ("v4", "v5p", "v7", "7x"))
        except Exception:
            _MULTI_TC = False
    return _MULTI_TC


_ROLL_IS_NUMPY = None


def _roll_shift(delta, n):
    """pltpu.roll shift realizing out[i] = in[(i + delta) % n] along axis 0.

    Probed once with a tiny kernel so the 3x3 tap-shift direction is correct
    regardless of the roll convention of the installed jax version.
    """
    global _ROLL_IS_NUMPY
    if delta % n == 0:
        return 0
    if _ROLL_IS_NUMPY is None:
        def _probe(x_ref, o_ref):
            o_ref[...] = pltpu.roll(x_ref[...], 1, axis=0)

        xp = jnp.arange(8 * 128, dtype=jnp.float32).reshape(8, 128)
        yp = pl.pallas_call(
            _probe, out_shape=jax.ShapeDtypeStruct((8, 128), jnp.float32))(xp)
        _ROLL_IS_NUMPY = bool(yp[1, 0] == xp[0, 0])   # np.roll: out[i]=in[i-s]
    return (n - delta) % n if _ROLL_IS_NUMPY else delta % n


# --------------------------------------------------------------------------
# GEMM + fused folded-BN / residual / ReLU  (single K step, no padding)
# --------------------------------------------------------------------------
def _mm_bn_kernel(*refs, relu, has_res):
    if has_res:
        a_ref, b_ref, s_ref, c_ref, r_ref, o_ref = refs
    else:
        a_ref, b_ref, s_ref, c_ref, o_ref = refs
        r_ref = None
    y = jnp.dot(a_ref[...], b_ref[...], preferred_element_type=jnp.float32)
    y = y * s_ref[...] + c_ref[...]
    if has_res:
        y = y + r_ref[...].astype(jnp.float32)
    if relu:
        y = jnp.maximum(y, 0.0)
    o_ref[...] = y.astype(o_ref.dtype)


def _pick_tm(M, K, N, has_res):
    """Largest M tile (an exact divisor -> no runtime padding) whose per-step
    VMEM footprint stays modest; small M runs as one full-extent block."""
    if M <= 512:
        return M
    k_eff = _round_up(K, 128)
    row_bytes = 2 * k_eff + (10 if has_res else 8) * N
    cap = (6 * 1024 * 1024) // row_bytes
    cap = max(128, min(2048, cap)) // 16 * 16
    if M <= cap:
        return M
    for t in range(cap, 15, -16):
        if M % t == 0:
            return t
    for t in range(min(cap, M), 7, -8):
        if M % t == 0:
            return t
    return M


def matmul_scale_bias(a, w, scale, bias, *, relu, residual=None,
                      out_dtype=jnp.bfloat16):
    """(a @ w) * scale + bias (+ residual) (+ ReLU).

    a: (M, K) activation; w: (K, N) bf16 weight; scale/bias: (1, N) f32.
    """
    M, K = a.shape
    Kw, N = w.shape
    assert K == Kw, (K, Kw)
    a = a.astype(jnp.bfloat16)
    has_res = residual is not None

    tm = _pick_tm(M, K, N, has_res)
    tn = N
    if _multi_tc() and (M // tm) * (N // tn) < 2:
        # feed both TensorCores: prefer splitting M, otherwise N
        if tm % 32 == 0:
            tm //= 2
        elif N >= 256:
            tn = N // 2
    gm, gn = M // tm, N // tn

    inputs = [a, w, scale, bias]
    in_specs = [
        pl.BlockSpec((tm, K), lambda i, j: (i, 0)),
        pl.BlockSpec((K, tn), lambda i, j: (0, j)),
        pl.BlockSpec((1, tn), lambda i, j: (0, j)),
        pl.BlockSpec((1, tn), lambda i, j: (0, j)),
    ]
    if has_res:
        inputs.append(residual.astype(jnp.bfloat16))
        in_specs.append(pl.BlockSpec((tm, tn), lambda i, j: (i, j)))

    return pl.pallas_call(
        partial(_mm_bn_kernel, relu=relu, has_res=has_res),
        out_shape=jax.ShapeDtypeStruct((M, N), out_dtype),
        grid_spec=pltpu.PrefetchScalarGridSpec(
            num_scalar_prefetch=0,
            grid=(gm, gn),
            in_specs=in_specs,
            out_specs=pl.BlockSpec((tm, tn), lambda i, j: (i, j)),
        ),
        compiler_params=pltpu.CompilerParams(
            dimension_semantics=("parallel", "parallel"),
            vmem_limit_bytes=VMEM_LIMIT),
    )(*inputs)


# --------------------------------------------------------------------------
# Implicit-GEMM 3x3 / stride-1 conv + folded BN + ReLU (no HBM im2col)
# --------------------------------------------------------------------------
def _conv3x3_kernel(x_ref, w_ref, s_ref, b_ref, o_ref, *, H, W, Wp8, shifts):
    """One image: x_ref (H+2, Wp8, C) zero-padded (Wp8 = round_up(W+2, 8)),
    w_ref (9, C, N) taps, o_ref (H, W, N).

    The padded image is flattened to (rows, C); tap (dy, dx) is the row range
    [dy*Wp8, dy*Wp8 + H*Wp8) of the flat image rolled by dx, so all 9 tap
    operands are aligned slices feeding MXU matmuls.  Junk columns (w >= W)
    accumulate harmless values and are sliced off before the store.
    """
    Hp = x_ref.shape[0]
    C = x_ref.shape[2]
    N = o_ref.shape[-1]
    M = H * Wp8
    n_rows = Hp * Wp8
    flat_bf = x_ref[...].reshape(n_rows, C)          # layout-preserving merge
    flat32 = flat_bf.astype(jnp.float32)             # 32-bit copy for rolls
    acc = None
    for dx in range(3):
        if shifts[dx] == 0:
            a_dx = flat_bf
        else:
            # sublane roll done on 32-bit data (packed-dtype-safe), back to
            # bf16 for the MXU
            a_dx = pltpu.roll(flat32, shifts[dx], axis=0).astype(jnp.bfloat16)
        for dy in range(3):
            a = a_dx[dy * Wp8:dy * Wp8 + M]
            p = jnp.dot(a, w_ref[3 * dy + dx],
                        preferred_element_type=jnp.float32)
            acc = p if acc is None else acc + p
    y = jnp.maximum(acc * s_ref[...] + b_ref[...], 0.0)
    y = y.reshape(H, Wp8, N)[:, :W, :]
    o_ref[...] = y.astype(o_ref.dtype)


def conv3x3_s1_bn_relu(x, w_taps, scale, bias):
    """Conv2d(3x3, stride=1, pad=1, bias=False) + folded BN + ReLU, NHWC."""
    B, H, W, C = x.shape
    N = w_taps.shape[-1]
    Wp8 = _round_up(W + 2, 8)
    Hp = H + 2
    n_rows = Hp * Wp8
    xp = jnp.pad(x, ((0, 0), (1, 1), (1, Wp8 - W - 1), (0, 0)))
    shifts = tuple(_roll_shift(dx, n_rows) for dx in range(3))
    return pl.pallas_call(
        partial(_conv3x3_kernel, H=H, W=W, Wp8=Wp8, shifts=shifts),
        out_shape=jax.ShapeDtypeStruct((B, H, W, N), x.dtype),
        grid_spec=pltpu.PrefetchScalarGridSpec(
            num_scalar_prefetch=0,
            grid=(B,),
            in_specs=[
                pl.BlockSpec((None, Hp, Wp8, C), lambda b: (b, 0, 0, 0)),
                pl.BlockSpec((9, C, N), lambda b: (0, 0, 0)),
                pl.BlockSpec((1, N), lambda b: (0, 0)),
                pl.BlockSpec((1, N), lambda b: (0, 0)),
            ],
            out_specs=pl.BlockSpec((None, H, W, N), lambda b: (b, 0, 0, 0)),
        ),
        compiler_params=pltpu.CompilerParams(
            dimension_semantics=("parallel",),
            vmem_limit_bytes=VMEM_LIMIT),
    )(xp, w_taps, scale, bias)


# --------------------------------------------------------------------------
# MaxPool2d(3, stride=2, padding=1)
# --------------------------------------------------------------------------
def _maxpool_kernel(w0_ref, w1_ref, w2_ref, o_ref):
    m = jnp.maximum(jnp.maximum(w0_ref[...], w1_ref[...]), w2_ref[...])
    Ho, Wo, C = o_ref.shape[1], o_ref.shape[2], o_ref.shape[3]
    a = m[:, 0:2 * Ho, :, :].reshape(1, Ho, 2, Wo, C)
    top = jnp.maximum(a[:, :, 0], a[:, :, 1])                 # rows 2h, 2h+1
    b = m[:, 2:2 * Ho + 2, :, :].reshape(1, Ho, 2, Wo, C)[:, :, 0]  # row 2h+2
    o_ref[...] = jnp.maximum(top, b)


def maxpool_3x3_s2_p1(x):
    B, H, W, C = x.shape
    Ho = (H + 2 - 3) // 2 + 1
    Wo = (W + 2 - 3) // 2 + 1
    Hp = H + 2
    xp = jnp.pad(x, ((0, 0), (1, 1), (1, 1), (0, 0)),
                 constant_values=-jnp.inf)
    w0 = xp[:, :, 0:2 * Wo:2, :]
    w1 = xp[:, :, 1:2 * Wo + 1:2, :]
    w2 = xp[:, :, 2:2 * Wo + 2:2, :]
    in_spec = pl.BlockSpec((1, Hp, Wo, C), lambda b: (b, 0, 0, 0))
    return pl.pallas_call(
        _maxpool_kernel,
        out_shape=jax.ShapeDtypeStruct((B, Ho, Wo, C), x.dtype),
        grid_spec=pltpu.PrefetchScalarGridSpec(
            num_scalar_prefetch=0, grid=(B,),
            in_specs=[in_spec, in_spec, in_spec],
            out_specs=pl.BlockSpec((1, Ho, Wo, C), lambda b: (b, 0, 0, 0))),
        compiler_params=pltpu.CompilerParams(dimension_semantics=("parallel",)),
    )(w0, w1, w2)


# --------------------------------------------------------------------------
# Fused tail: AvgPool2d(7) -> flatten -> fc_ctr -> (cls_head, F.normalize)
# --------------------------------------------------------------------------
def _tail_kernel(x_ref, fw_ref, fb_ref, cw_ref, cb_ref, out_ref, xn_ref):
    x = x_ref[...].astype(jnp.float32)                  # (B, 49, 2048)
    enc = jnp.mean(x, axis=1)                           # (B, 2048)
    feat = jnp.dot(enc.astype(jnp.bfloat16), fw_ref[...],
                   preferred_element_type=jnp.float32) + fb_ref[...]
    y = jnp.dot(feat, cw_ref[...],
                preferred_element_type=jnp.float32) + cb_ref[...]
    out_ref[...] = jnp.maximum(y, 0.0)                  # cls_head: Linear+ReLU
    nrm = jnp.sqrt(jnp.sum(feat * feat, axis=1, keepdims=True))
    xn_ref[...] = feat / jnp.maximum(nrm, 1e-12)        # F.normalize(dim=1)


def tail_head(x, fc_w, fc_b, cls_w, cls_b):
    B, H, W, C = x.shape
    x2 = x.reshape(B, H * W, C)
    out, xn = pl.pallas_call(
        _tail_kernel,
        out_shape=(jax.ShapeDtypeStruct((B, 128), jnp.float32),
                   jax.ShapeDtypeStruct((B, 128), jnp.float32)),
        grid_spec=pltpu.PrefetchScalarGridSpec(
            num_scalar_prefetch=0, grid=(1,),
            in_specs=[pl.BlockSpec((B, H * W, C), lambda i: (0, 0, 0)),
                      pl.BlockSpec((C, 128), lambda i: (0, 0)),
                      pl.BlockSpec((1, 128), lambda i: (0, 0)),
                      pl.BlockSpec((128, 128), lambda i: (0, 0)),
                      pl.BlockSpec((1, 128), lambda i: (0, 0))],
            out_specs=[pl.BlockSpec((B, 128), lambda i: (0, 0)),
                       pl.BlockSpec((B, 128), lambda i: (0, 0))]),
    )(x2, fc_w, fc_b, cls_w, cls_b)
    return out[:, :1], xn


# --------------------------------------------------------------------------
# Conv glue
# --------------------------------------------------------------------------
def _im2col(x, kh, kw, stride, pad):
    B, H, W, C = x.shape
    Ho = (H + 2 * pad - kh) // stride + 1
    Wo = (W + 2 * pad - kw) // stride + 1
    xp = jnp.pad(x, ((0, 0), (pad, pad), (pad, pad), (0, 0))) if pad else x
    cols = []
    for dy in range(kh):
        for dx in range(kw):
            cols.append(xp[:, dy:dy + Ho * stride:stride,
                           dx:dx + Wo * stride:stride, :])
    patches = jnp.concatenate(cols, axis=-1)
    return patches.reshape(B * Ho * Wo, kh * kw * C), Ho, Wo


def conv_bn(x, wsb, *, kh, stride, pad, relu, residual=None):
    """Conv2d(bias=False) + folded eval-mode BN (+ residual) (+ ReLU)."""
    w, s, b = wsb
    B = x.shape[0]
    if kh == 3 and stride == 1:
        assert relu and residual is None
        return conv3x3_s1_bn_relu(x, w, s, b)
    if kh == 1:
        xs = x[:, ::stride, ::stride, :] if stride != 1 else x
        Ho, Wo = xs.shape[1], xs.shape[2]
        A = xs.reshape(B * Ho * Wo, xs.shape[3])
    else:
        A, Ho, Wo = _im2col(x, kh, kh, stride, pad)
    n_out = w.shape[-1]
    y = matmul_scale_bias(A, w, s, b, relu=relu, residual=residual)
    return y.reshape(B, Ho, Wo, n_out)


# --------------------------------------------------------------------------
# Parameters (deterministic synthetic init, matching the module's init)
# --------------------------------------------------------------------------
def _bn_fold(c):
    gamma = jnp.ones((c,), jnp.float32)   # BatchNorm2d weight init: 1
    beta = jnp.zeros((c,), jnp.float32)   # bias init: 0
    mean = jnp.zeros((c,), jnp.float32)   # running stats at init (eval mode)
    var = jnp.ones((c,), jnp.float32)
    scale = gamma / jnp.sqrt(var + BN_EPS)
    bias = beta - mean * scale
    return scale.reshape(1, c), bias.reshape(1, c)


def _prep_conv(w_oihw, fmt):
    """OIHW f32 weight -> bf16 GEMM layout + folded-BN scale/bias.
       fmt='mat': (KH*KW*Cin, Cout)   (1x1 convs and HBM-im2col convs)
       fmt='tap': (KH*KW, Cin, Cout)  (implicit-GEMM stride-1 3x3 convs)"""
    Cout, Cin, KH, KW = w_oihw.shape
    wt = jnp.transpose(w_oihw, (2, 3, 1, 0))          # (KH, KW, Cin, Cout)
    if fmt == 'tap':
        wm = wt.reshape(KH * KW, Cin, Cout)
    else:
        wm = wt.reshape(KH * KW * Cin, Cout)
    s, b = _bn_fold(Cout)
    return wm.astype(jnp.bfloat16), s, b


def make_params(key):
    keys = iter(jax.random.split(key, 128))

    def conv(cout, cin, kh, fmt='mat'):
        n = kh * kh * cout                 # module init: N(0, sqrt(2/n))
        w = (jax.random.normal(next(keys), (cout, cin, kh, kh), jnp.float32)
             * math.sqrt(2.0 / n))
        return _prep_conv(w, fmt)

    params = {'conv1': conv(64, 3, 7)}

    inplanes = 64
    layers = []
    for planes, nblocks, lstride in LAYER_CFG:
        blocks = []
        for bi in range(nblocks):
            st = lstride if bi == 0 else 1
            blk = {
                'c1': conv(planes, inplanes, 1),
                'c2': conv(planes, planes, 3, fmt='tap' if st == 1 else 'mat'),
                'c3': conv(planes * 4, planes, 1),
            }
            if st != 1 or inplanes != planes * 4:
                blk['cd'] = conv(planes * 4, inplanes, 1)
            blocks.append(blk)
            inplanes = planes * 4
        layers.append(blocks)
    params['layers'] = layers

    # fc_ctr: Linear(2048, 128)  (stored as (in, out), bf16 for the MXU)
    kfc = 1.0 / math.sqrt(2048)
    params['fc_w'] = jax.random.uniform(
        next(keys), (2048, 128), jnp.float32, -kfc, kfc).astype(jnp.bfloat16)
    params['fc_b'] = jax.random.uniform(next(keys), (128,), jnp.float32,
                                        -kfc, kfc).reshape(1, 128)
    # cls_head: Linear(128, 1) + ReLU   (output padded to 128 lanes)
    kcl = 1.0 / math.sqrt(128)
    cls_w = jax.random.uniform(next(keys), (128, 1), jnp.float32, -kcl, kcl)
    cls_b = jax.random.uniform(next(keys), (1,), jnp.float32, -kcl, kcl)
    params['cls_w'] = jnp.pad(cls_w, ((0, 0), (0, 127)))
    params['cls_b'] = jnp.pad(cls_b, (0, 127)).reshape(1, 128)
    # NOTE: encoder.linear (2048->1) exists in the PyTorch module but its
    # output is discarded by contraNet_ada_emb.forward, so it is not computed.
    return params


# --------------------------------------------------------------------------
# Forward pass (== contraNet_ada_emb.forward in eval mode)
# --------------------------------------------------------------------------
def forward(params, x_nchw):
    # NCHW (PyTorch) -> NHWC (channels on the lane axis); activations in bf16.
    x = jnp.transpose(x_nchw, (0, 2, 3, 1)).astype(jnp.bfloat16)
    x = conv_bn(x, params['conv1'], kh=7, stride=2, pad=3, relu=True)
    x = maxpool_3x3_s2_p1(x)

    for li, (planes, nblocks, lstride) in enumerate(LAYER_CFG):
        for bi in range(nblocks):
            blk = params['layers'][li][bi]
            st = lstride if bi == 0 else 1
            out = conv_bn(x, blk['c1'], kh=1, stride=1, pad=0, relu=True)
            out = conv_bn(out, blk['c2'], kh=3, stride=st, pad=1, relu=True)
            if 'cd' in blk:
                res = conv_bn(x, blk['cd'], kh=1, stride=st, pad=0, relu=False)
            else:
                res = x
            res2 = res.reshape(-1, res.shape[-1])
            # conv3 + BN3 + residual add + ReLU fused in the GEMM epilogue
            x = conv_bn(out, blk['c3'], kh=1, stride=1, pad=0, relu=True,
                        residual=res2)

    out, x_norm = tail_head(x, params['fc_w'], params['fc_b'],
                            params['cls_w'], params['cls_b'])
    return out, x_norm


if __name__ == "__main__":
    key = jax.random.PRNGKey(0)
    pkey, xkey = jax.random.split(key)
    params = make_params(pkey)
    # Input shape is pinned by the module: AvgPool2d(7) after a stride-32
    # encoder requires 224x224 spatial; batch kept small (2).  NCHW like
    # PyTorch.
    x = jax.random.normal(xkey, (2, 3, 224, 224), jnp.float32)

    _roll_shift(1, 8)   # probe pltpu.roll's convention once, outside jit

    fwd = jax.jit(forward)
    out, x_ctrst = fwd(params, x)
    jax.block_until_ready((out, x_ctrst))

    assert out.shape == (2, 1), out.shape
    assert x_ctrst.shape == (2, 128), x_ctrst.shape
    assert bool(jnp.all(out >= 0.0))                       # ReLU head
    assert bool(jnp.allclose(jnp.sum(x_ctrst * x_ctrst, axis=1),
                             jnp.ones((2,)), atol=1e-3))   # L2-normalized
    print("KERNEL_OK")
</pallas_src>

<mosaic_0001>
module attributes {stable_mosaic.version = 11 : i64} {
  func.func @_probe(%arg0: memref<8x128xf32, #tpu.memory_space<vmem>>, %arg1: memref<8x128xf32, #tpu.memory_space<vmem>>) attributes {dimension_semantics = [], scalar_prefetch = 0 : i64, scratch_operands = 0 : i64, tpu.core_type = #tpu.core_type<tc>} {
    %c0 = arith.constant 0 : index
    %c0_0 = arith.constant 0 : index
    %0 = vector.load %arg0[%c0, %c0_0] : memref<8x128xf32, #tpu.memory_space<vmem>>, vector<8x128xf32>
    %c1_i32 = arith.constant 1 : i32
    %1 = tpu.dynamic_rotate %0 by %c1_i32 dim 0 : vector<8x128xf32>, i32 -> vector<8x128xf32>
    %c0_1 = arith.constant 0 : index
    %c0_2 = arith.constant 0 : index
    %2 = vector.load %arg1[%c0_1, %c0_2] : memref<8x128xf32, #tpu.memory_space<vmem>>, vector<8x128xf32>
    tpu.vector_store %arg1[%c0_1, %c0_2], %1 {strides = array<i32>} : memref<8x128xf32, #tpu.memory_space<vmem>>, vector<8x128xf32>,
    return
  }
}

</mosaic_0001>

<bundles_post_ra>
// kernel: tpu_custom_call.1
= control target key start
LH: loop header
LB: loop body
LE: loop exit
PB: predicated region body
PF: predicated region fallthrough
CT: control target
= control target key end

     0   :  { %6 = vsyncpa [#allocation3], 0  ;;  %s103_s0 = inlined_call_operand.hbm [shape: f32[8,128], index: 0, kind: input, shape index: {}]   ;;  %s104_s1 = inlined_call_operand.hbm [shape: f32[8,128], index: 1, kind: output, shape index: {}]  }
   0x1   :  { %7 = vsyncpa [#allocation4], 0  ;;  %s85_s6 = smov [#allocation2]  }
   0x2   :  { %s14_s7 = sshll.u32 %s85_s6, 4  ;;  %s15_s7 = int_to_ptr.vmem [resolvable:$true] %s14_s7 }
   0x3   :  { %s49_s8 = scalar_lea.vmem %s15_s7, 128  ;;  %p54_p1 = scmp.lt.s32.totalorder %s15_s7, %s15_s7 }
   0x4   :  { %p50_p0 = scmp.ne.s32.totalorder %s15_s7, %s49_s8  ;;  %p55_p2 = scmp.lt.s32.totalorder %s49_s8, %s49_s8 }
   0x6   :  { %p56_p3 = por %p55_p2, %p54_p1 }
   0x8   :  { %p57_p4 = pnand %p56_p3, %p50_p0 }
   0xa   :  { %60 = shalt.err (!%p57_p4)
}
   0xb   :  { %17 = dma.hbm_to_vmem [thread:$0]  %s103_s0, 128, %s15_s7, [#allocation3]  }
   0xc   :  { %81 = dma.done.wait [#allocation3], 128  }
   0xd   :  { %82 = vsyncadd [#allocation3], 4294967168  ;;  %s86_s11 = smov [#allocation5]   ;;  %v21_v0 = vld [vmem:[#allocation2] sm:$0xff] }
   0xe   :  { %s30_s12 = sshll.u32 %s86_s11, 4  ;;  %v22_v1 = vrot.slane %v21_v0, 7  ;;  %s31_s12 = int_to_ptr.vmem [resolvable:$true] %s30_s12 }
   0xf   :  { %s61_s13 = scalar_lea.vmem %s31_s12, 128  ;;  %p66_p6 = scmp.lt.s32.totalorder %s31_s12, %s31_s12 }
  0x10   :  { %23 = vst [vmem:[#allocation5] sm:$0xff] %v22_v1  ;;  %p62_p5 = scmp.ne.s32.totalorder %s31_s12, %s61_s13  ;;  %p67_p7 = scmp.lt.s32.totalorder %s61_s13, %s61_s13 }
  0x12   :  { %p68_p8 = por %p67_p7, %p66_p6 }
  0x14   :  { %p69_p9 = pnand %p68_p8, %p62_p5 }
  0x16   :  { %72 = shalt.err (!%p69_p9)
}
  0x17   :  { %33 = dma.vmem_to_hbm [thread:$0]  %s31_s12, 128, %s104_s1, [#allocation4]  }
  0x18   :  { %83 = dma.done.wait [#allocation4], 128  }
  0x19   :  { %84 = vsyncadd [#allocation4], 4294967168 }
  0x1a   :  { %37 = vsyncpa [#allocation3], 1 }
  0x1b   :  { %38 = vsyncpa [#allocation4], 1 }

</bundles_post_ra>
